<compile_context>
chip_gen: v7x
topology: tpu7x:2x2x1
jax: 0.10.0
libtpu: 0.0.40
codegen_flags: <defaults>
</compile_context>

<pallas_src>
import jax
import jax.numpy as jnp
from jax.experimental import pallas as pl
from jax.experimental.pallas import tpu as pltpu

LANE = 128      # vreg lane width  -> batch axis
SUBLANE = 8     # f32 sublane granularity -> feature axes


def _round_up(v, m):
    return ((v + m - 1) // m) * m


# ----------------------------- kernel ----------------------------------------


def _make_mlp_kernel(num_linear: int, activation_type: str):
    """Kernel ref order: (xT_ref, w0, b0, ..., w{L-1}, b{L-1}, oT_ref).

    All tensors are in the transposed layout: xT (in_pad, batch_tile),
    w (out_pad, in_pad) [PyTorch layout], b (out_pad, 1), oT (out_pad, batch_tile).
    """
    if activation_type == "relu":
        act = lambda h: jnp.maximum(h, 0.0)
    elif activation_type == "tanh":
        act = jnp.tanh
    else:
        raise ValueError(f"unknown activation_type: {activation_type}")

    def kernel(x_ref, *refs):
        o_ref = refs[-1]
        param_refs = refs[:-1]
        assert len(param_refs) == 2 * num_linear

        h = x_ref[...]                        # (in_pad, tile) f32, batch on lanes
        for i in range(num_linear):
            w = param_refs[2 * i][...]        # (out_pad, in_pad) f32
            b = param_refs[2 * i + 1][...]    # (out_pad, 1) f32 -> lane broadcast
            h = jnp.dot(w, h, preferred_element_type=jnp.float32) + b
            if i < num_linear - 1:
                h = act(h)                    # hidden layers only
        o_ref[...] = h.astype(o_ref.dtype)
        # nn.Dropout is the eval-mode identity -> nothing to emit.

    return kernel


# ----------------------------- parameter prep (one-time) ---------------------


def prepare_mlp_params(params):
    """One-time preprocessing, hoisted out of the forward path.

    params: list of (W, b) in the PyTorch nn.Linear layout W:(out, in), b:(out,).
    Returns (W_pad, b_pad) pairs zero-padded to 8-row sublane multiples; b_pad
    has shape (out_pad, 1) so it lane-broadcasts over the batch inside the kernel.
    """
    prepared = []
    for w, b in params:
        out_d, in_d = w.shape
        out_p, in_p = _round_up(out_d, SUBLANE), _round_up(in_d, SUBLANE)
        w_p = (jnp.zeros((out_p, in_p), jnp.float32)
               .at[:out_d, :in_d].set(jnp.asarray(w, jnp.float32)))
        b_p = (jnp.zeros((out_p, 1), jnp.float32)
               .at[:out_d, 0].set(jnp.asarray(b, jnp.float32)))
        prepared.append((w_p, b_p))
    return prepared


# ----------------------------- wrapper ----------------------------------------


def mlp_comfort_forward(x, prepared_params, n_outputs, activation_type="relu",
                        batch_tile=None):
    """MLP_comfort forward via a single Pallas TPU kernel.

    x:               (batch, n_features) float32
    prepared_params: output of prepare_mlp_params (padded, PyTorch (out,in) layout)
    n_outputs:       true (unpadded) output width
    """
    batch, n_features = x.shape
    num_linear = len(prepared_params)
    in_pad = prepared_params[0][0].shape[1]
    out_pad = prepared_params[-1][0].shape[0]
    assert n_features <= in_pad
    for i in range(1, num_linear):
        assert prepared_params[i][0].shape[1] == prepared_params[i - 1][0].shape[0]

    param_bytes = sum(w.size * 4 + b.size * 4 for w, b in prepared_params)

    # ---- choose the batch tile (lane axis) -----------------------------------
    bp = _round_up(batch, LANE)

    def _footprint(tile):
        # double-buffered x / out tiles + resident (single-buffered) params
        return 2 * tile * (in_pad + out_pad) * 4 + param_bytes

    budget = 40 << 20        # conservative vs. v7x's 64 MiB VMEM
    if param_bytes > budget:
        # TODO(synk): add an N/K-tiled 2-D grid fallback (pl.when-guarded
        # accumulator) for very wide layers whose resident weights exceed VMEM
        # (mainly v7x, 64 MiB) instead of failing here.
        raise NotImplementedError("resident weights exceed the VMEM budget")

    if batch_tile is None:
        if bp <= LANE:
            batch_tile = bp                                 # single 128-lane step
        else:
            # keep >= 2 grid steps (v7x megacore sharding) but grow the tile
            # toward 2048 lanes to amortise per-step overhead.
            batch_tile = max(LANE, min(2048, (bp // 2) // LANE * LANE))
            if batch_tile >= 2 * LANE:
                # full 256-wide MXU pushes on v6e/v7x (no-op on v5e's 128-wide MXU)
                batch_tile = (batch_tile // 256) * 256
    batch_tile = max(LANE, _round_up(batch_tile, LANE))
    while _footprint(batch_tile) > budget and batch_tile > LANE:
        batch_tile = max(LANE, _round_up(batch_tile // 2, LANE))

    grid = (pl.cdiv(bp, batch_tile),)
    batch_pad = grid[0] * batch_tile

    # ---- x^T with batch on lanes; pad only when actually needed --------------
    x32 = jnp.asarray(x, jnp.float32)
    if in_pad == n_features and batch_pad == batch:
        x_t = x32.T                                          # tiny transpose, no pad copy
    else:
        x_t = (jnp.zeros((in_pad, batch_pad), jnp.float32)
               .at[:n_features, :batch].set(x32.T))

    flat_inputs = [x_t]
    for w_p, b_p in prepared_params:
        flat_inputs.append(w_p)
        flat_inputs.append(b_p)

    out_specs = pl.BlockSpec((out_pad, batch_tile), lambda i: (0, i))

    # ---- cost estimate (padded dims) ------------------------------------------
    dims_p = [in_pad] + [w.shape[0] for w, _ in prepared_params]
    flops = 2 * batch_pad * sum(dims_p[i] * dims_p[i + 1] for i in range(num_linear))
    transcendentals = batch_pad * sum(dims_p[1:-1]) if activation_type == "tanh" else 0
    bytes_accessed = x_t.size * 4 + param_bytes + batch_pad * out_pad * 4

    # vmem_limit: allow for double-buffered params too, in case single-buffering
    # (pl.Buffered(1)) is not honoured by this JAX version.
    vmem_limit = int(min(max(_footprint(batch_tile) + param_bytes + (4 << 20),
                             16 << 20), 48 << 20))

    kernel = _make_mlp_kernel(num_linear, activation_type)

    def _resident_spec(shape, single_buffer):
        """Grid-constant (weight/bias) operand: resident across all grid steps."""
        index_map = lambda i: tuple(0 for _ in shape)
        if single_buffer:
            return pl.BlockSpec(shape, index_map, pipeline_mode=pl.Buffered(1))
        return pl.BlockSpec(shape, index_map)

    def _run(single_buffer_params):
        in_specs = [pl.BlockSpec((in_pad, batch_tile), lambda i: (0, i))]
        for w_p, b_p in prepared_params:
            in_specs.append(_resident_spec(w_p.shape, single_buffer_params))
            in_specs.append(_resident_spec(b_p.shape, single_buffer_params))
        return pl.pallas_call(
            kernel,
            out_shape=jax.ShapeDtypeStruct((out_pad, batch_pad), jnp.float32),
            grid_spec=pltpu.PrefetchScalarGridSpec(
                num_scalar_prefetch=0,
                grid=grid,
                in_specs=in_specs,
                out_specs=out_specs,
            ),
            compiler_params=pltpu.CompilerParams(
                # NOTE(v7x): check via xprof that the "parallel" axis really
                # shards across both TensorCores; if not, switch to CORE_PARALLEL.
                dimension_semantics=("parallel",),
                vmem_limit_bytes=vmem_limit,
            ),
            cost_estimate=pl.CostEstimate(
                flops=flops,
                transcendentals=transcendentals,
                bytes_accessed=bytes_accessed,
            ),
        )(*flat_inputs)

    try:
        out_t = _run(True)      # weights/biases single-buffered (grid-resident)
    except Exception:           # older JAX without pipeline_mode / Buffered(1)
        out_t = _run(False)

    # Strip padding and return in the module's (batch, n_outputs) layout.
    return out_t[:n_outputs, :batch].T


# ----------------------------- parameter init / reference --------------------


def init_mlp_params(key, n_features, n_outputs, layers):
    """Deterministic synthetic parameters mirroring nn.Linear.

    Returns a list of (W, b) in the PyTorch layout: W (out, in), b (out,).
    """
    params = []
    sizes = [n_features] + list(layers) + [n_outputs]
    for i in range(len(sizes) - 1):
        fan_in, fan_out = sizes[i], sizes[i + 1]
        key, kw, kb = jax.random.split(key, 3)
        bound = 1.0 / jnp.sqrt(jnp.float32(fan_in))
        w = jax.random.uniform(kw, (fan_out, fan_in), jnp.float32, -bound, bound)
        b = jax.random.uniform(kb, (fan_out,), jnp.float32, -bound, bound)
        params.append((w, b))
    return params


def mlp_reference(x, params, activation_type="relu"):
    """Pure-JAX f32 reference of the PyTorch forward pass (for verification)."""
    act = jnp.tanh if activation_type == "tanh" else (lambda h: jnp.maximum(h, 0.0))
    h = x
    for i, (w, b) in enumerate(params):
        h = jnp.dot(h, w.T, preferred_element_type=jnp.float32) + b
        if i < len(params) - 1:
            h = act(h)
    return h


# ----------------------------- main -------------------------------------------


if __name__ == "__main__":
    # Shapes consistent with MLP_comfort(n_features, n_outputs, layers, ...).
    # batch=256 gives two 128-lane grid steps (megacore-friendly) while small.
    batch = 256
    n_features = 8
    layers = [32, 16]
    n_outputs = 4
    activation_type = "relu"
    # dropout = 0.1 -> identity at inference time; not applied in the kernel.

    key = jax.random.PRNGKey(0)
    key, kx = jax.random.split(key)
    x = jax.random.normal(kx, (batch, n_features), dtype=jnp.float32)

    params = init_mlp_params(key, n_features, n_outputs, layers)
    prepared = prepare_mlp_params(params)          # one-time, outside the forward path

    out = mlp_comfort_forward(x, prepared, n_outputs, activation_type=activation_type)
    out = jax.block_until_ready(out)
    assert out.shape == (batch, n_outputs)

    # Both kernel and reference are f32 with f32 accumulation; the tolerance
    # only covers possible MXU vs. XLA default-precision differences for f32
    # matmul inputs (bf16-pass decomposition).
    ref = mlp_reference(x, params, activation_type)
    max_err = float(jnp.max(jnp.abs(out - ref)))
    assert jnp.allclose(out, ref, atol=2e-2, rtol=2e-2), \
        f"mismatch vs f32 reference (max abs err {max_err})"

    print("KERNEL_OK")
</pallas_src>

<mosaic_0001>
module attributes {stable_mosaic.version = 11 : i64} {
  func.func @kernel(%arg0: i32, %arg1: memref<8x128xf32, #tpu.memory_space<vmem>>, %arg2: memref<32x8xf32, #tpu.memory_space<vmem>>, %arg3: memref<32x1xf32, #tpu.memory_space<vmem>>, %arg4: memref<16x32xf32, #tpu.memory_space<vmem>>, %arg5: memref<16x1xf32, #tpu.memory_space<vmem>>, %arg6: memref<8x16xf32, #tpu.memory_space<vmem>>, %arg7: memref<8x1xf32, #tpu.memory_space<vmem>>, %arg8: memref<8x128xf32, #tpu.memory_space<vmem>>) attributes {dimension_semantics = [#tpu.dimension_semantics<parallel>], iteration_bounds = array<i64: 2>, scalar_prefetch = 0 : i64, scratch_operands = 0 : i64, tpu.core_type = #tpu.core_type<tc>, window_params = [{transform_indices = @transform_0, window_bounds = array<i64: 8, 128>}, {pipeline_mode = #tpu.pipeline_mode<synchronous>, transform_indices = @transform_1, window_bounds = array<i64: 32, 8>}, {pipeline_mode = #tpu.pipeline_mode<synchronous>, transform_indices = @transform_2, window_bounds = array<i64: 32, 1>}, {pipeline_mode = #tpu.pipeline_mode<synchronous>, transform_indices = @transform_3, window_bounds = array<i64: 16, 32>}, {pipeline_mode = #tpu.pipeline_mode<synchronous>, transform_indices = @transform_4, window_bounds = array<i64: 16, 1>}, {pipeline_mode = #tpu.pipeline_mode<synchronous>, transform_indices = @transform_5, window_bounds = array<i64: 8, 16>}, {pipeline_mode = #tpu.pipeline_mode<synchronous>, transform_indices = @transform_6, window_bounds = array<i64: 8, 1>}, {transform_indices = @transform_7, window_bounds = array<i64: 8, 128>}]} {
    %c0 = arith.constant 0 : index
    %c0_0 = arith.constant 0 : index
    %0 = vector.load %arg1[%c0, %c0_0] : memref<8x128xf32, #tpu.memory_space<vmem>>, vector<8x128xf32>
    %c0_1 = arith.constant 0 : index
    %c0_2 = arith.constant 0 : index
    %1 = vector.load %arg2[%c0_1, %c0_2] : memref<32x8xf32, #tpu.memory_space<vmem>>, vector<32x8xf32>
    %c0_3 = arith.constant 0 : index
    %c0_4 = arith.constant 0 : index
    %2 = vector.load %arg3[%c0_3, %c0_4] : memref<32x1xf32, #tpu.memory_space<vmem>>, vector<32x1xf32>
    %cst = arith.constant dense<0.000000e+00> : vector<32x128xf32>
    %3 = tpu.matmul %1, %0, %cst {dimension_numbers = #tpu.dot_dimension_numbers<[1], [0], [0], [1], [0, 0, 1, 1], [], []>} : vector<32x8xf32>, vector<8x128xf32>, vector<32x128xf32> -> vector<32x128xf32>
    %4 = vector.broadcast %2 : vector<32x1xf32> to vector<32x128xf32>
    %5 = arith.addf %3, %4 : vector<32x128xf32>
    %cst_5 = arith.constant 0.000000e+00 : f32
    %6 = vector.broadcast %cst_5 : f32 to vector<32x128xf32>
    %7 = arith.maximumf %5, %6 : vector<32x128xf32>
    %c0_6 = arith.constant 0 : index
    %c0_7 = arith.constant 0 : index
    %8 = vector.load %arg4[%c0_6, %c0_7] : memref<16x32xf32, #tpu.memory_space<vmem>>, vector<16x32xf32>
    %c0_8 = arith.constant 0 : index
    %c0_9 = arith.constant 0 : index
    %9 = vector.load %arg5[%c0_8, %c0_9] : memref<16x1xf32, #tpu.memory_space<vmem>>, vector<16x1xf32>
    %cst_10 = arith.constant dense<0.000000e+00> : vector<16x128xf32>
    %10 = tpu.matmul %8, %7, %cst_10 {dimension_numbers = #tpu.dot_dimension_numbers<[1], [0], [0], [1], [0, 0, 1, 1], [], []>} : vector<16x32xf32>, vector<32x128xf32>, vector<16x128xf32> -> vector<16x128xf32>
    %11 = vector.broadcast %9 : vector<16x1xf32> to vector<16x128xf32>
    %12 = arith.addf %10, %11 : vector<16x128xf32>
    %cst_11 = arith.constant 0.000000e+00 : f32
    %13 = vector.broadcast %cst_11 : f32 to vector<16x128xf32>
    %14 = arith.maximumf %12, %13 : vector<16x128xf32>
    %c0_12 = arith.constant 0 : index
    %c0_13 = arith.constant 0 : index
    %15 = vector.load %arg6[%c0_12, %c0_13] : memref<8x16xf32, #tpu.memory_space<vmem>>, vector<8x16xf32>
    %c0_14 = arith.constant 0 : index
    %c0_15 = arith.constant 0 : index
    %16 = vector.load %arg7[%c0_14, %c0_15] : memref<8x1xf32, #tpu.memory_space<vmem>>, vector<8x1xf32>
    %cst_16 = arith.constant dense<0.000000e+00> : vector<8x128xf32>
    %17 = tpu.matmul %15, %14, %cst_16 {dimension_numbers = #tpu.dot_dimension_numbers<[1], [0], [0], [1], [0, 0, 1, 1], [], []>} : vector<8x16xf32>, vector<16x128xf32>, vector<8x128xf32> -> vector<8x128xf32>
    %18 = vector.broadcast %16 : vector<8x1xf32> to vector<8x128xf32>
    %19 = arith.addf %17, %18 : vector<8x128xf32>
    %c0_17 = arith.constant 0 : index
    %c0_18 = arith.constant 0 : index
    %20 = vector.load %arg8[%c0_17, %c0_18] : memref<8x128xf32, #tpu.memory_space<vmem>>, vector<8x128xf32>
    tpu.vector_store %arg8[%c0_17, %c0_18], %19 {strides = array<i32>} : memref<8x128xf32, #tpu.memory_space<vmem>>, vector<8x128xf32>,
    return
  }
  func.func @transform_0(%arg0: i32) -> (i32, i32) {
    %c0_i32 = arith.constant 0 : i32
    %c0_i32_0 = arith.constant 0 : i32
    return %c0_i32, %arg0 : i32, i32
  }
  func.func @transform_1(%arg0: i32) -> (i32, i32) {
    %c0_i32 = arith.constant 0 : i32
    %c0_i32_0 = arith.constant 0 : i32
    %c0_i32_1 = arith.constant 0 : i32
    return %c0_i32, %c0_i32_0 : i32, i32
  }
  func.func @transform_2(%arg0: i32) -> (i32, i32) {
    %c0_i32 = arith.constant 0 : i32
    %c0_i32_0 = arith.constant 0 : i32
    %c0_i32_1 = arith.constant 0 : i32
    return %c0_i32, %c0_i32_0 : i32, i32
  }
  func.func @transform_3(%arg0: i32) -> (i32, i32) {
    %c0_i32 = arith.constant 0 : i32
    %c0_i32_0 = arith.constant 0 : i32
    %c0_i32_1 = arith.constant 0 : i32
    return %c0_i32, %c0_i32_0 : i32, i32
  }
  func.func @transform_4(%arg0: i32) -> (i32, i32) {
    %c0_i32 = arith.constant 0 : i32
    %c0_i32_0 = arith.constant 0 : i32
    %c0_i32_1 = arith.constant 0 : i32
    return %c0_i32, %c0_i32_0 : i32, i32
  }
  func.func @transform_5(%arg0: i32) -> (i32, i32) {
    %c0_i32 = arith.constant 0 : i32
    %c0_i32_0 = arith.constant 0 : i32
    %c0_i32_1 = arith.constant 0 : i32
    return %c0_i32, %c0_i32_0 : i32, i32
  }
  func.func @transform_6(%arg0: i32) -> (i32, i32) {
    %c0_i32 = arith.constant 0 : i32
    %c0_i32_0 = arith.constant 0 : i32
    %c0_i32_1 = arith.constant 0 : i32
    return %c0_i32, %c0_i32_0 : i32, i32
  }
  func.func @transform_7(%arg0: i32) -> (i32, i32) {
    %c0_i32 = arith.constant 0 : i32
    %c0_i32_0 = arith.constant 0 : i32
    return %c0_i32, %arg0 : i32, i32
  }
}

module attributes {stable_mosaic.version = 11 : i64} {
  func.func @kernel(%arg0: i32, %arg1: memref<8x128xf32, #tpu.memory_space<vmem>>, %arg2: memref<32x8xf32, #tpu.memory_space<vmem>>, %arg3: memref<32x1xf32, #tpu.memory_space<vmem>>, %arg4: memref<16x32xf32, #tpu.memory_space<vmem>>, %arg5: memref<16x1xf32, #tpu.memory_space<vmem>>, %arg6: memref<8x16xf32, #tpu.memory_space<vmem>>, %arg7: memref<8x1xf32, #tpu.memory_space<vmem>>, %arg8: memref<8x128xf32, #tpu.memory_space<vmem>>) attributes {dimension_semantics = [#tpu.dimension_semantics<parallel>], iteration_bounds = array<i64: 2>, scalar_prefetch = 0 : i64, scratch_operands = 0 : i64, tpu.core_type = #tpu.core_type<tc>, window_params = [{transform_indices = @transform_0, window_bounds = array<i64: 8, 128>}, {pipeline_mode = #tpu.pipeline_mode<synchronous>, transform_indices = @transform_1, window_bounds = array<i64: 32, 8>}, {pipeline_mode = #tpu.pipeline_mode<synchronous>, transform_indices = @transform_2, window_bounds = array<i64: 32, 1>}, {pipeline_mode = #tpu.pipeline_mode<synchronous>, transform_indices = @transform_3, window_bounds = array<i64: 16, 32>}, {pipeline_mode = #tpu.pipeline_mode<synchronous>, transform_indices = @transform_4, window_bounds = array<i64: 16, 1>}, {pipeline_mode = #tpu.pipeline_mode<synchronous>, transform_indices = @transform_5, window_bounds = array<i64: 8, 16>}, {pipeline_mode = #tpu.pipeline_mode<synchronous>, transform_indices = @transform_6, window_bounds = array<i64: 8, 1>}, {transform_indices = @transform_7, window_bounds = array<i64: 8, 128>}]} {
    %c0 = arith.constant 0 : index
    %c0_0 = arith.constant 0 : index
    %0 = vector.load %arg1[%c0, %c0_0] : memref<8x128xf32, #tpu.memory_space<vmem>>, vector<8x128xf32>
    %c0_1 = arith.constant 0 : index
    %c0_2 = arith.constant 0 : index
    %1 = vector.load %arg2[%c0_1, %c0_2] : memref<32x8xf32, #tpu.memory_space<vmem>>, vector<32x8xf32>
    %c0_3 = arith.constant 0 : index
    %c0_4 = arith.constant 0 : index
    %2 = vector.load %arg3[%c0_3, %c0_4] : memref<32x1xf32, #tpu.memory_space<vmem>>, vector<32x1xf32>
    %cst = arith.constant dense<0.000000e+00> : vector<32x128xf32>
    %3 = tpu.matmul %1, %0, %cst {dimension_numbers = #tpu.dot_dimension_numbers<[1], [0], [0], [1], [0, 0, 1, 1], [], []>} : vector<32x8xf32>, vector<8x128xf32>, vector<32x128xf32> -> vector<32x128xf32>
    %4 = vector.broadcast %2 : vector<32x1xf32> to vector<32x128xf32>
    %5 = arith.addf %3, %4 : vector<32x128xf32>
    %cst_5 = arith.constant 0.000000e+00 : f32
    %6 = vector.broadcast %cst_5 : f32 to vector<32x128xf32>
    %7 = arith.maximumf %5, %6 : vector<32x128xf32>
    %c0_6 = arith.constant 0 : index
    %c0_7 = arith.constant 0 : index
    %8 = vector.load %arg4[%c0_6, %c0_7] : memref<16x32xf32, #tpu.memory_space<vmem>>, vector<16x32xf32>
    %c0_8 = arith.constant 0 : index
    %c0_9 = arith.constant 0 : index
    %9 = vector.load %arg5[%c0_8, %c0_9] : memref<16x1xf32, #tpu.memory_space<vmem>>, vector<16x1xf32>
    %cst_10 = arith.constant dense<0.000000e+00> : vector<16x128xf32>
    %10 = tpu.matmul %8, %7, %cst_10 {dimension_numbers = #tpu.dot_dimension_numbers<[1], [0], [0], [1], [0, 0, 1, 1], [], []>} : vector<16x32xf32>, vector<32x128xf32>, vector<16x128xf32> -> vector<16x128xf32>
    %11 = vector.broadcast %9 : vector<16x1xf32> to vector<16x128xf32>
    %12 = arith.addf %10, %11 : vector<16x128xf32>
    %cst_11 = arith.constant 0.000000e+00 : f32
    %13 = vector.broadcast %cst_11 : f32 to vector<16x128xf32>
    %14 = arith.maximumf %12, %13 : vector<16x128xf32>
    %c0_12 = arith.constant 0 : index
    %c0_13 = arith.constant 0 : index
    %15 = vector.load %arg6[%c0_12, %c0_13] : memref<8x16xf32, #tpu.memory_space<vmem>>, vector<8x16xf32>
    %c0_14 = arith.constant 0 : index
    %c0_15 = arith.constant 0 : index
    %16 = vector.load %arg7[%c0_14, %c0_15] : memref<8x1xf32, #tpu.memory_space<vmem>>, vector<8x1xf32>
    %cst_16 = arith.constant dense<0.000000e+00> : vector<8x128xf32>
    %17 = tpu.matmul %15, %14, %cst_16 {dimension_numbers = #tpu.dot_dimension_numbers<[1], [0], [0], [1], [0, 0, 1, 1], [], []>} : vector<8x16xf32>, vector<16x128xf32>, vector<8x128xf32> -> vector<8x128xf32>
    %18 = vector.broadcast %16 : vector<8x1xf32> to vector<8x128xf32>
    %19 = arith.addf %17, %18 : vector<8x128xf32>
    %c0_17 = arith.constant 0 : index
    %c0_18 = arith.constant 0 : index
    %20 = vector.load %arg8[%c0_17, %c0_18] : memref<8x128xf32, #tpu.memory_space<vmem>>, vector<8x128xf32>
    tpu.vector_store %arg8[%c0_17, %c0_18], %19 {strides = array<i32>} : memref<8x128xf32, #tpu.memory_space<vmem>>, vector<8x128xf32>,
    return
  }
  func.func @transform_0(%arg0: i32) -> (i32, i32) {
    %c0_i32 = arith.constant 0 : i32
    %c0_i32_0 = arith.constant 0 : i32
    return %c0_i32, %arg0 : i32, i32
  }
  func.func @transform_1(%arg0: i32) -> (i32, i32) {
    %c0_i32 = arith.constant 0 : i32
    %c0_i32_0 = arith.constant 0 : i32
    %c0_i32_1 = arith.constant 0 : i32
    return %c0_i32, %c0_i32_0 : i32, i32
  }
  func.func @transform_2(%arg0: i32) -> (i32, i32) {
    %c0_i32 = arith.constant 0 : i32
    %c0_i32_0 = arith.constant 0 : i32
    %c0_i32_1 = arith.constant 0 : i32
    return %c0_i32, %c0_i32_0 : i32, i32
  }
  func.func @transform_3(%arg0: i32) -> (i32, i32) {
    %c0_i32 = arith.constant 0 : i32
    %c0_i32_0 = arith.constant 0 : i32
    %c0_i32_1 = arith.constant 0 : i32
    return %c0_i32, %c0_i32_0 : i32, i32
  }
  func.func @transform_4(%arg0: i32) -> (i32, i32) {
    %c0_i32 = arith.constant 0 : i32
    %c0_i32_0 = arith.constant 0 : i32
    %c0_i32_1 = arith.constant 0 : i32
    return %c0_i32, %c0_i32_0 : i32, i32
  }
  func.func @transform_5(%arg0: i32) -> (i32, i32) {
    %c0_i32 = arith.constant 0 : i32
    %c0_i32_0 = arith.constant 0 : i32
    %c0_i32_1 = arith.constant 0 : i32
    return %c0_i32, %c0_i32_0 : i32, i32
  }
  func.func @transform_6(%arg0: i32) -> (i32, i32) {
    %c0_i32 = arith.constant 0 : i32
    %c0_i32_0 = arith.constant 0 : i32
    %c0_i32_1 = arith.constant 0 : i32
    return %c0_i32, %c0_i32_0 : i32, i32
  }
  func.func @transform_7(%arg0: i32) -> (i32, i32) {
    %c0_i32 = arith.constant 0 : i32
    %c0_i32_0 = arith.constant 0 : i32
    return %c0_i32, %arg0 : i32, i32
  }
}

</mosaic_0001>

<bundles_post_ra>
// kernel: tpu_custom_call.1
= control target key start
LH: loop header
LB: loop body
LE: loop exit
PB: predicated region body
PF: predicated region fallthrough
CT: control target
= control target key end

     0   :  { %12 = vsyncpa [#allocation3], 0  ;;  %s1028_s0 = inlined_call_operand.vmem [shape: f32[8,256], index: 0, kind: input, shape index: {}]   ;;  %s1029_s1 = inlined_call_operand.vmem [shape: f32[32,8], index: 1, kind: input, shape index: {}]   ;;  %s1030_s2 = inlined_call_operand.vmem [shape: f32[32,1], index: 2, kind: input, shape index: {}]   ;;  %s1031_s3 = inlined_call_operand.vmem [shape: f32[16,32], index: 3, kind: input, shape index: {}]   ;;  %s1032_s4 = inlined_call_operand.vmem [shape: f32[16,1], index: 4, kind: input, shape index: {}]   ;;  %s1033_s5 = inlined_call_operand.vmem [shape: f32[8,16], index: 5, kind: input, shape index: {}]   ;;  %s1034_s6 = inlined_call_operand.vmem [shape: f32[8,1], index: 6, kind: input, shape index: {}]   ;;  %s1035_s7 = inlined_call_operand.hbm [shape: f32[8,256], index: 7, kind: output, shape index: {}]  }
   0x1   :  { %14 = vsyncpa [#allocation3 + $0x1], 0  ;;  %s880_s24 = smov 0   ;;  %s882_s25 = smov 0  }
   0x2   :  { %s884_s26 = smov 0   ;;  %s886_s27 = smov 0  }
   0x3 LB: > { %s901_s28 = sadd.s32 4294967295, %s833_s27   ;;  %s658_s29 = sadd.s32 4294967294, %s833_s27   ;;  %s833_s27 = sphi %s886_s27, %s1041_s27   ;;  %s829_s26 = sphi %s884_s26, %s1040_s26   ;;  %s825_s25 = sphi %s882_s25, %s1039_s25   ;;  %s821_s24 = sphi %s880_s24, %s1038_s24  }
   0x4   : > { %s905_s30 = sadd.s32 1, %s833_s27   ;;  %s179_s8 = sadd.s32 1, %s829_s26 }
   0x5   : > { %s176_s9 = ssub.s32 %s833_s27, %s905_s30  ;;  %p189_p0 = scmp.ne.s32.totalorder %s829_s26, %s825_s25 }
   0x6   : > { %p177_p1 = scmp.eq.s32.totalorder %s176_s9, 0  ;;  %p190_p2 = scmp.eq.s32.totalorder %s901_s28, 1 }
   0x7   : > { %p195_p3 = scmp.ne.s32.totalorder %s825_s25, %s821_s24  ;;  %p196_p4 = scmp.eq.s32.totalorder %s658_s29, 1 }
   0x8   : > { %s916_s10 = scalar_select %p177_p1, %s829_s26, %s179_s8  }
   0x9   : > { %p918_p5 = por %p190_p2, %p189_p0  ;;  %p922_p6 = por %p196_p4, %p195_p3 }
   0xa   : > { %p661_p7 = scmp.ge.s32.totalorder %s833_s27, 1  ;;  %p239_p8 = scmp.lt.s32.totalorder %s833_s27, 3 }
   0xc   : > { %p240_p9 = pnand %p661_p7, %p239_p8 }
   0xd   : > { %p270_p10 = scmp.lt.s32.totalorder (!%p240_p9), %s901_s28, 1  ;;  %v275_v0 = vld [vmem:[%s1029_s1] sm:$0xff] (!%p240_p9)  ;;  %vm303_vm0 = vcmask (!%p240_p9), 64512   ;;  %v835_v1 = vmov (!%p240_p9), 0   ;;  %v281_v3 = vld [vmem:[%s1030_s2 + $0x10] sm:$0xff] (!%p240_p9)  ;;  %v280_v4 = vld [vmem:[%s1030_s2 + $0x8] sm:$0xff] (!%p240_p9) }
   0xe   : > { %243 = sbr.rel (%p240_p9) target bundleno = 705 (0x2c1), region = 48  ;;  %691 = vmatprep.mubr.msk.f32.mxu0 (!%p240_p9), %vm303_vm0, %v275_v0  ;;  %769 = vset.pattern.permute.xlu0 (!%p240_p9), %v835_v1  ;;  %v279_v2 = vld [vmem:[%s1030_s2] sm:$0xff] (!%p240_p9)  ;;  %v282_v5 = vld [vmem:[%s1030_s2 + $0x18] sm:$0xff] (!%p240_p9)  ;;  %v276_v7 = vld [vmem:[%s1029_s1 + $0x8] sm:$0xff] (!%p240_p9)  ;;  %vm419_vm1 = vcmask (!%p240_p9), 261120   ;;  %v836_v33 = vmov (!%p240_p9), 0.0|0.0  }
   0xf   : > { %285 = vperm.xlu0 (!%p240_p9), %769, %v279_v2   ;;  %770 = vset.pattern.permute.xlu1 (!%p240_p9), %v835_v1  ;;  %v277_v8 = vld [vmem:[%s1029_s1 + $0x10] sm:$0xff] (!%p240_p9)  ;;  %v407_v9 = vld [vmem:[%s1032_s4] sm:$0xff] (!%p240_p9)  ;;  %v408_v10 = vld [vmem:[%s1032_s4 + $0x8] sm:$0xff] (!%p240_p9)  ;;  %vm837_vm2 = vmmov (!%p240_p9), 0   ;;  %v838_v34 = vmov (!%p240_p9), 0.0   ;;  %vm510_vm3 = vcmask (!%p240_p9), 130048  }
  0x10   : > { %295 = vperm.xlu1 (!%p240_p9), %770, %v281_v3   ;;  %v278_v11 = vld [vmem:[%s1029_s1 + $0x18] sm:$0xff] (!%p240_p9)  ;;  %v504_v12 = vld [vmem:[%s1034_s6] sm:$0xff] (!%p240_p9)  ;;  %v406_v32 = vld [vmem:[%s1031_s3 + $0x8] sm:$0xff] (!%p240_p9)  ;;  %s672_s20 = sshll.u32 (!%p240_p9), %s901_s28, 7 }
  0x11   : > { %v405_v13 = vld [vmem:[%s1031_s3] sm:$0xff] (!%p240_p9)  ;;  %s986_s8 = scalar_lea.hbm (!%p240_p9), %s1035_s7, %s672_s20 }
  0x12   : > { %705 = vmatprep.mubr.msk.f32.mxu1 (!%p240_p9), %vm419_vm1, %v405_v13  ;;  %v503_v44 = vld [vmem:[%s1033_s5] sm:$0xff] (!%p240_p9) }
  0x13   : > { %290 = vperm.xlu0 (!%p240_p9), %769, %v280_v4  }
  0x14   : > { %300 = vperm.xlu1 (!%p240_p9), %770, %v282_v5  }
  0x15   : > { %s271_s17 = scalar_select %p270_p10, %s901_s28, 1 }
  0x16   : > { %s839_s28 = smov [#allocation2]  }
  0x17   : > { %s663_s22 = sshll.u32 %s271_s17, 3  ;;  %411 = vperm.xlu0 %769, %v407_v9   ;;  %s267_s17 = sand.u32 1, %s825_s25  }
  0x18   : > { %s273_s13 = scalar_lea.vmem %s1028_s0, %s663_s22  ;;  %416 = vperm.xlu1 %770, %v408_v10   ;;  %s662_s19 = sshll.u32 %s267_s17, 3 }
  0x19   : > { %v274_v6 = vld [vmem:[%s273_s13] sm:$0xff]  ;;  %s269_s21 = scalar_lea.vmem [#allocation2], %s662_s19  ;;  %s586_s9 = scalar_lea.sflag [#allocation3], %s267_s17 }
  0x1a   : > { %689 = vmatprep.subr.mxu0 %v274_v6  ;;  %s599_s22 = sshll.u32 %s269_s21, 4  ;;  %s775_s14 = sshll.u32 %s839_s28, 4  ;;  %s988_s22 = int_to_ptr.vmem [resolvable:$true] %s599_s22  ;;  %s776_s14 = int_to_ptr.vmem [resolvable:$false] %s775_s14 }
  0x1b   : > { %690 = vmatpush3.msra.mxu0 %v274_v6  ;;  %507 = vperm.xlu0 %769, %v504_v12   ;;  %s771_s13 = scalar_lea.vmem %s988_s22, 128  ;;  %s777_s15 = scalar_lea.vmem %s776_s14, 256 }
  0x1c   : > { %692 = vmatmul.mubr.msk.f32.vlgmr.msra.gmra.mrb[0].mxu0 %vm303_vm0, %v276_v7  ;;  %723 = vmatprep.subr.bf16.mxu0 %v836_v33  ;;  %p772_p11 = scmp.ne.s32.totalorder %s988_s22, %s771_s13  ;;  %p778_p0 = scmp.lt.s32.totalorder %s988_s22, %s776_s14 }
  0x1d   : > { %694 = vmatprep.mubr.msk.f32.mxu0 %vm303_vm0, %v277_v8  ;;  %p779_p1 = scmp.lt.s32.totalorder %s777_s15, %s771_s13 }
  0x1e   : > { %p773_p12 = pnand %p772_p11, %p918_p5 }
  0x1f   : > { %p780_p2 = por %p779_p1, %p778_p0 }
  0x20   : > { %695 = vmatmul.mubr.msk.f32.gmra.mrb[2].mxu0 %vm303_vm0, %v278_v11  ;;  %p774_p13 = pneg %p773_p12 }
  0x21   : > { %712 = vmatprep.mubr.msk.f32.mxu0 %vm837_vm2, %v838_v34 }
  0x22   : > { %p781_p3 = pnand %p780_p2, %p774_p13 }
  0x8e   : > { %v286_v14 = vpop.permute.xlu0 %285 }
  0x8f   : > { %v296_v15 = vpop.permute.xlu1 %295 }
  0x92   : > { %v291_v16 = vpop.permute.xlu0 %290 }
  0x93   : > { %v301_v22 = vpop.permute.xlu1 %300 }
  0x96   : > { %v412_v37 = vpop.permute.xlu0 %411 }
  0x97   : > { %v417_v35 = vpop.permute.xlu1 %416 }
  0x9a   : > { %v508_v45 = vpop.permute.xlu0 %507 }
  0xef   : > { %v693_v17 = vpop.f32.mrb[0].mxu0 }
  0xf0   : > { %v388_v18 = vadd.f32 %v693_v17, %v291_v16  ;;  %v382_v19 = vpop.f32.mrb[1].mxu0 }
  0xf1   : > { %v383_v20 = vadd.f32 %v382_v19, %v286_v14 }
  0xf2   : > { %v402_v21 = vmax.f32 %v388_v18, 0.0 }
  0xf3   : > { %v401_v23 = vmax.f32 %v383_v20, 0.0  ;;  %v696_v24 = vpop.f32.mrb[2].mxu0 }
  0xf4   : > { %v398_v25 = vadd.f32 %v696_v24, %v301_v22  ;;  %v392_v26 = vpop.f32.mrb[3].mxu0 }
  0xf5   : > { %v393_v27 = vadd.f32 %v392_v26, %v296_v15  ;;  %v715_v28 = vpack.c.bf16 %v402_v21, %v401_v23 }
  0xf6   : > { %v404_v29 = vmax.f32 %v398_v25, 0.0 }
  0xf7   : > { %v403_v30 = vmax.f32 %v393_v27, 0.0  ;;  %716 = vmatprep.subr.bf16.mxu1 %v715_v28 }
  0xf8   : > { %718 = vmatpush3.bf16.msra.mxu1 %v715_v28 }
  0xf9   : > { %v719_v31 = vpack.c.bf16 %v404_v29, %v403_v30 }
  0xfb   : > { %720 = vmatprep.subr.bf16.mxu1 %v719_v31 }
  0xfc   : > { %722 = vmatpush3.bf16.msra.mxu1 %v719_v31 }
  0xff   : > { %706 = vmatmul.mubr.msk.f32.vlgmr.msra.gmra.mrb[0].mxu1 %vm419_vm1, %v406_v32 }
 0x1d2   : > { %v707_v36 = vpop.f32.mrb[0].mxu1 }
 0x1d3   : > { %v498_v38 = vadd.f32 %v707_v36, %v417_v35  ;;  %v492_v39 = vpop.f32.mrb[1].mxu1 }
 0x1d4   : > { %v493_v40 = vadd.f32 %v492_v39, %v412_v37 }
 0x1d5   : > { %v502_v41 = vmax.f32 %v498_v38, 0.0 }
 0x1d6   : > { %v501_v42 = vmax.f32 %v493_v40, 0.0 }
 0x1d8   : > { %v724_v43 = vpack.c.bf16 %v502_v41, %v501_v42 }
 0x1da   : > { %725 = vmatpush3.bf16.msra.mxu0 %v724_v43 }
 0x1dd   : > { %713 = vmatmul.mubr.msk.f32.vlgmr.msra.gmra.mrb[4].mxu0 %vm510_vm3, %v503_v44 }
 0x2b0   : > { %v580_v46 = vpop.f32.mrb[4].mxu0 }
 0x2b1   : > { %v581_v47 = vadd.f32 %v580_v46, %v508_v45  ;;  %v714_v48 = vpop.f32.mrb[5].mxu0 }
 0x2b3   : > { %584 = vst [vmem:[%s269_s21] sm:$0xff] %v581_v47 }
 0x2b4   : > { %784 = shalt.err (!%p781_p3)
}
 0x2b5   : > { %s785_s16 = scalar_lea.hbm %s986_s8, 128  ;;  %s789_s19 = scalar_lea.hbm %s1035_s7, 256 }
 0x2b6   : > { %p786_p4 = scmp.ne.s32.totalorder %s986_s8, %s785_s16  ;;  %p790_p9 = scmp.lt.u32.totalorder %s986_s8, %s1035_s7 }
 0x2b7   : > { %p791_p10 = scmp.lt.u32.totalorder %s789_s19, %s785_s16  ;;  %p793_p12 = scmp.lt.u32.totalorder %s785_s16, %s986_s8 }
 0x2b8   : > { %p787_p7 = pnand %p786_p4, %p918_p5 }
 0x2b9   : > { %p792_p11 = por %p791_p10, %p790_p9 }
 0x2ba   : > { %p788_p8 = pneg %p787_p7 }
 0x2bb   : > { %p794_p13 = por %p793_p12, %p792_p11 }
 0x2bd   : > { %p795_p0 = pnand %p794_p13, %p788_p8 }
 0x2bf   : > { %798 = shalt.err (!%p795_p0)
}
 0x2c0   : > { %726 = dma.vmem_to_hbm [thread:$0]  (%p918_p5), %s988_s22, 128, %s986_s8, %s586_s9  }
 0x2c1 PF: > { %p732_p1 = scmp.ge.s32.totalorder %s833_s27, 2  ;;  %s611_s23 = sand.u32 1, %s821_s24  }
 0x2c2   : > { %s612_s29 = scalar_lea.sflag [#allocation3], %s611_s23 }
 0x2c3   : > { %p729_p2 = pnand %p732_p1, %p922_p6 }
 0x2c5   : > { %816 = dma.done.wait (!%p729_p2), %s612_s29, 128  }
 0x2c6   : > { %818 = vsyncadd (!%p729_p2), %s612_s29, 4294967168  ;;  %p17_p3 = scmp.ge.s32.totalorder %s905_s30, 4   ;;  %s1038_s24 = smov %s825_s25 }
 0x2c7   : > { %s1039_s25 = smov %s829_s26  ;;  %s1040_s26 = smov %s916_s10 }
 0x2c8   : > { %s1041_s27 = smov %s905_s30  ;;  %19 = sbr.rel (!%p17_p3) target bundleno = 3 (0x3), region = 83 }
 0x2cf   :  { %617 = vsyncpa [#allocation3], 1 }
 0x2d0   :  { %619 = vsyncpa [#allocation3 + $0x1], 1 }

// kernel: tpu_custom_call.1
= control target key start
LH: loop header
LB: loop body
LE: loop exit
PB: predicated region body
PF: predicated region fallthrough
CT: control target
= control target key end

     0   :  { %12 = vsyncpa [#allocation3], 0  ;;  %s1028_s0 = inlined_call_operand.vmem [shape: f32[8,256], index: 0, kind: input, shape index: {}]   ;;  %s1029_s1 = inlined_call_operand.vmem [shape: f32[32,8], index: 1, kind: input, shape index: {}]   ;;  %s1030_s2 = inlined_call_operand.vmem [shape: f32[32,1], index: 2, kind: input, shape index: {}]   ;;  %s1031_s3 = inlined_call_operand.vmem [shape: f32[16,32], index: 3, kind: input, shape index: {}]   ;;  %s1032_s4 = inlined_call_operand.vmem [shape: f32[16,1], index: 4, kind: input, shape index: {}]   ;;  %s1033_s5 = inlined_call_operand.vmem [shape: f32[8,16], index: 5, kind: input, shape index: {}]   ;;  %s1034_s6 = inlined_call_operand.vmem [shape: f32[8,1], index: 6, kind: input, shape index: {}]   ;;  %s1035_s7 = inlined_call_operand.hbm [shape: f32[8,256], index: 7, kind: output, shape index: {}]  }
   0x1   :  { %14 = vsyncpa [#allocation3 + $0x1], 0  ;;  %s880_s24 = smov 0   ;;  %s882_s25 = smov 0  }
   0x2   :  { %s884_s26 = smov 0   ;;  %s886_s27 = smov 0  }
   0x3 LB: > { %s901_s28 = sadd.s32 4294967295, %s833_s27   ;;  %s658_s29 = sadd.s32 4294967294, %s833_s27   ;;  %s833_s27 = sphi %s886_s27, %s1041_s27   ;;  %s829_s26 = sphi %s884_s26, %s1040_s26   ;;  %s825_s25 = sphi %s882_s25, %s1039_s25   ;;  %s821_s24 = sphi %s880_s24, %s1038_s24  }
   0x4   : > { %s905_s30 = sadd.s32 1, %s833_s27   ;;  %s179_s8 = sadd.s32 1, %s829_s26 }
   0x5   : > { %s176_s9 = ssub.s32 %s833_s27, %s905_s30  ;;  %p189_p0 = scmp.ne.s32.totalorder %s829_s26, %s825_s25 }
   0x6   : > { %p177_p1 = scmp.eq.s32.totalorder %s176_s9, 0  ;;  %p190_p2 = scmp.eq.s32.totalorder %s901_s28, 1 }
   0x7   : > { %p195_p3 = scmp.ne.s32.totalorder %s825_s25, %s821_s24  ;;  %p196_p4 = scmp.eq.s32.totalorder %s658_s29, 1 }
   0x8   : > { %s916_s10 = scalar_select %p177_p1, %s829_s26, %s179_s8  }
   0x9   : > { %p918_p5 = por %p190_p2, %p189_p0  ;;  %p922_p6 = por %p196_p4, %p195_p3 }
   0xa   : > { %p661_p7 = scmp.ge.s32.totalorder %s833_s27, 1  ;;  %p239_p8 = scmp.lt.s32.totalorder %s833_s27, 3 }
   0xc   : > { %p240_p9 = pnand %p661_p7, %p239_p8 }
   0xd   : > { %p270_p10 = scmp.lt.s32.totalorder (!%p240_p9), %s901_s28, 1  ;;  %v275_v0 = vld [vmem:[%s1029_s1] sm:$0xff] (!%p240_p9)  ;;  %vm303_vm0 = vcmask (!%p240_p9), 64512   ;;  %v835_v1 = vmov (!%p240_p9), 0   ;;  %v281_v3 = vld [vmem:[%s1030_s2 + $0x10] sm:$0xff] (!%p240_p9)  ;;  %v280_v4 = vld [vmem:[%s1030_s2 + $0x8] sm:$0xff] (!%p240_p9) }
   0xe   : > { %243 = sbr.rel (%p240_p9) target bundleno = 705 (0x2c1), region = 48  ;;  %691 = vmatprep.mubr.msk.f32.mxu0 (!%p240_p9), %vm303_vm0, %v275_v0  ;;  %769 = vset.pattern.permute.xlu0 (!%p240_p9), %v835_v1  ;;  %v279_v2 = vld [vmem:[%s1030_s2] sm:$0xff] (!%p240_p9)  ;;  %v282_v5 = vld [vmem:[%s1030_s2 + $0x18] sm:$0xff] (!%p240_p9)  ;;  %v276_v7 = vld [vmem:[%s1029_s1 + $0x8] sm:$0xff] (!%p240_p9)  ;;  %vm419_vm1 = vcmask (!%p240_p9), 261120   ;;  %v836_v33 = vmov (!%p240_p9), 0.0|0.0  }
   0xf   : > { %285 = vperm.xlu0 (!%p240_p9), %769, %v279_v2   ;;  %770 = vset.pattern.permute.xlu1 (!%p240_p9), %v835_v1  ;;  %v277_v8 = vld [vmem:[%s1029_s1 + $0x10] sm:$0xff] (!%p240_p9)  ;;  %v407_v9 = vld [vmem:[%s1032_s4] sm:$0xff] (!%p240_p9)  ;;  %v408_v10 = vld [vmem:[%s1032_s4 + $0x8] sm:$0xff] (!%p240_p9)  ;;  %vm837_vm2 = vmmov (!%p240_p9), 0   ;;  %v838_v34 = vmov (!%p240_p9), 0.0   ;;  %vm510_vm3 = vcmask (!%p240_p9), 130048  }
  0x10   : > { %295 = vperm.xlu1 (!%p240_p9), %770, %v281_v3   ;;  %v278_v11 = vld [vmem:[%s1029_s1 + $0x18] sm:$0xff] (!%p240_p9)  ;;  %v504_v12 = vld [vmem:[%s1034_s6] sm:$0xff] (!%p240_p9)  ;;  %v406_v32 = vld [vmem:[%s1031_s3 + $0x8] sm:$0xff] (!%p240_p9)  ;;  %s672_s20 = sshll.u32 (!%p240_p9), %s901_s28, 7 }
  0x11   : > { %v405_v13 = vld [vmem:[%s1031_s3] sm:$0xff] (!%p240_p9)  ;;  %s986_s8 = scalar_lea.hbm (!%p240_p9), %s1035_s7, %s672_s20 }
  0x12   : > { %705 = vmatprep.mubr.msk.f32.mxu1 (!%p240_p9), %vm419_vm1, %v405_v13  ;;  %v503_v44 = vld [vmem:[%s1033_s5] sm:$0xff] (!%p240_p9) }
  0x13   : > { %290 = vperm.xlu0 (!%p240_p9), %769, %v280_v4  }
  0x14   : > { %300 = vperm.xlu1 (!%p240_p9), %770, %v282_v5  }
  0x15   : > { %s271_s17 = scalar_select %p270_p10, %s901_s28, 1 }
  0x16   : > { %s839_s28 = smov [#allocation2]  }
  0x17   : > { %s663_s22 = sshll.u32 %s271_s17, 3  ;;  %411 = vperm.xlu0 %769, %v407_v9   ;;  %s267_s17 = sand.u32 1, %s825_s25  }
  0x18   : > { %s273_s13 = scalar_lea.vmem %s1028_s0, %s663_s22  ;;  %416 = vperm.xlu1 %770, %v408_v10   ;;  %s662_s19 = sshll.u32 %s267_s17, 3 }
  0x19   : > { %v274_v6 = vld [vmem:[%s273_s13] sm:$0xff]  ;;  %s269_s21 = scalar_lea.vmem [#allocation2], %s662_s19  ;;  %s586_s9 = scalar_lea.sflag [#allocation3], %s267_s17 }
  0x1a   : > { %689 = vmatprep.subr.mxu0 %v274_v6  ;;  %s599_s22 = sshll.u32 %s269_s21, 4  ;;  %s775_s14 = sshll.u32 %s839_s28, 4  ;;  %s988_s22 = int_to_ptr.vmem [resolvable:$true] %s599_s22  ;;  %s776_s14 = int_to_ptr.vmem [resolvable:$false] %s775_s14 }
  0x1b   : > { %690 = vmatpush3.msra.mxu0 %v274_v6  ;;  %507 = vperm.xlu0 %769, %v504_v12   ;;  %s771_s13 = scalar_lea.vmem %s988_s22, 128  ;;  %s777_s15 = scalar_lea.vmem %s776_s14, 256 }
  0x1c   : > { %692 = vmatmul.mubr.msk.f32.vlgmr.msra.gmra.mrb[0].mxu0 %vm303_vm0, %v276_v7  ;;  %723 = vmatprep.subr.bf16.mxu0 %v836_v33  ;;  %p772_p11 = scmp.ne.s32.totalorder %s988_s22, %s771_s13  ;;  %p778_p0 = scmp.lt.s32.totalorder %s988_s22, %s776_s14 }
  0x1d   : > { %694 = vmatprep.mubr.msk.f32.mxu0 %vm303_vm0, %v277_v8  ;;  %p779_p1 = scmp.lt.s32.totalorder %s777_s15, %s771_s13 }
  0x1e   : > { %p773_p12 = pnand %p772_p11, %p918_p5 }
  0x1f   : > { %p780_p2 = por %p779_p1, %p778_p0 }
  0x20   : > { %695 = vmatmul.mubr.msk.f32.gmra.mrb[2].mxu0 %vm303_vm0, %v278_v11  ;;  %p774_p13 = pneg %p773_p12 }
  0x21   : > { %712 = vmatprep.mubr.msk.f32.mxu0 %vm837_vm2, %v838_v34 }
  0x22   : > { %p781_p3 = pnand %p780_p2, %p774_p13 }
  0x8e   : > { %v286_v14 = vpop.permute.xlu0 %285 }
  0x8f   : > { %v296_v15 = vpop.permute.xlu1 %295 }
  0x92   : > { %v291_v16 = vpop.permute.xlu0 %290 }
  0x93   : > { %v301_v22 = vpop.permute.xlu1 %300 }
  0x96   : > { %v412_v37 = vpop.permute.xlu0 %411 }
  0x97   : > { %v417_v35 = vpop.permute.xlu1 %416 }
  0x9a   : > { %v508_v45 = vpop.permute.xlu0 %507 }
  0xef   : > { %v693_v17 = vpop.f32.mrb[0].mxu0 }
  0xf0   : > { %v388_v18 = vadd.f32 %v693_v17, %v291_v16  ;;  %v382_v19 = vpop.f32.mrb[1].mxu0 }
  0xf1   : > { %v383_v20 = vadd.f32 %v382_v19, %v286_v14 }
  0xf2   : > { %v402_v21 = vmax.f32 %v388_v18, 0.0 }
  0xf3   : > { %v401_v23 = vmax.f32 %v383_v20, 0.0  ;;  %v696_v24 = vpop.f32.mrb[2].mxu0 }
  0xf4   : > { %v398_v25 = vadd.f32 %v696_v24, %v301_v22  ;;  %v392_v26 = vpop.f32.mrb[3].mxu0 }
  0xf5   : > { %v393_v27 = vadd.f32 %v392_v26, %v296_v15  ;;  %v715_v28 = vpack.c.bf16 %v402_v21, %v401_v23 }
  0xf6   : > { %v404_v29 = vmax.f32 %v398_v25, 0.0 }
  0xf7   : > { %v403_v30 = vmax.f32 %v393_v27, 0.0  ;;  %716 = vmatprep.subr.bf16.mxu1 %v715_v28 }
  0xf8   : > { %718 = vmatpush3.bf16.msra.mxu1 %v715_v28 }
  0xf9   : > { %v719_v31 = vpack.c.bf16 %v404_v29, %v403_v30 }
  0xfb   : > { %720 = vmatprep.subr.bf16.mxu1 %v719_v31 }
  0xfc   : > { %722 = vmatpush3.bf16.msra.mxu1 %v719_v31 }
  0xff   : > { %706 = vmatmul.mubr.msk.f32.vlgmr.msra.gmra.mrb[0].mxu1 %vm419_vm1, %v406_v32 }
 0x1d2   : > { %v707_v36 = vpop.f32.mrb[0].mxu1 }
 0x1d3   : > { %v498_v38 = vadd.f32 %v707_v36, %v417_v35  ;;  %v492_v39 = vpop.f32.mrb[1].mxu1 }
 0x1d4   : > { %v493_v40 = vadd.f32 %v492_v39, %v412_v37 }
 0x1d5   : > { %v502_v41 = vmax.f32 %v498_v38, 0.0 }
 0x1d6   : > { %v501_v42 = vmax.f32 %v493_v40, 0.0 }
 0x1d8   : > { %v724_v43 = vpack.c.bf16 %v502_v41, %v501_v42 }
 0x1da   : > { %725 = vmatpush3.bf16.msra.mxu0 %v724_v43 }
 0x1dd   : > { %713 = vmatmul.mubr.msk.f32.vlgmr.msra.gmra.mrb[4].mxu0 %vm510_vm3, %v503_v44 }
 0x2b0   : > { %v580_v46 = vpop.f32.mrb[4].mxu0 }
 0x2b1   : > { %v581_v47 = vadd.f32 %v580_v46, %v508_v45  ;;  %v714_v48 = vpop.f32.mrb[5].mxu0 }
 0x2b3   : > { %584 = vst [vmem:[%s269_s21] sm:$0xff] %v581_v47 }
 0x2b4   : > { %784 = shalt.err (!%p781_p3)
}
 0x2b5   : > { %s785_s16 = scalar_lea.hbm %s986_s8, 128  ;;  %s789_s19 = scalar_lea.hbm %s1035_s7, 256 }
 0x2b6   : > { %p786_p4 = scmp.ne.s32.totalorder %s986_s8, %s785_s16  ;;  %p790_p9 = scmp.lt.u32.totalorder %s986_s8, %s1035_s7 }
 0x2b7   : > { %p791_p10 = scmp.lt.u32.totalorder %s789_s19, %s785_s16  ;;  %p793_p12 = scmp.lt.u32.totalorder %s785_s16, %s986_s8 }
 0x2b8   : > { %p787_p7 = pnand %p786_p4, %p918_p5 }
 0x2b9   : > { %p792_p11 = por %p791_p10, %p790_p9 }
 0x2ba   : > { %p788_p8 = pneg %p787_p7 }
 0x2bb   : > { %p794_p13 = por %p793_p12, %p792_p11 }
 0x2bd   : > { %p795_p0 = pnand %p794_p13, %p788_p8 }
 0x2bf   : > { %798 = shalt.err (!%p795_p0)
}
 0x2c0   : > { %726 = dma.vmem_to_hbm [thread:$0]  (%p918_p5), %s988_s22, 128, %s986_s8, %s586_s9  }
 0x2c1 PF: > { %p732_p1 = scmp.ge.s32.totalorder %s833_s27, 2  ;;  %s611_s23 = sand.u32 1, %s821_s24  }
 0x2c2   : > { %s612_s29 = scalar_lea.sflag [#allocation3], %s611_s23 }
 0x2c3   : > { %p729_p2 = pnand %p732_p1, %p922_p6 }
 0x2c5   : > { %816 = dma.done.wait (!%p729_p2), %s612_s29, 128  }
 0x2c6   : > { %818 = vsyncadd (!%p729_p2), %s612_s29, 4294967168  ;;  %p17_p3 = scmp.ge.s32.totalorder %s905_s30, 4   ;;  %s1038_s24 = smov %s825_s25 }
 0x2c7   : > { %s1039_s25 = smov %s829_s26  ;;  %s1040_s26 = smov %s916_s10 }
 0x2c8   : > { %s1041_s27 = smov %s905_s30  ;;  %19 = sbr.rel (!%p17_p3) target bundleno = 3 (0x3), region = 83 }
 0x2cf   :  { %617 = vsyncpa [#allocation3], 1 }
 0x2d0   :  { %619 = vsyncpa [#allocation3 + $0x1], 1 }

</bundles_post_ra>
